<compile_context>
chip_gen: v5e
topology: v5e:2x2
jax: 0.10.0
libtpu: 0.0.40
codegen_flags: <defaults>
</compile_context>

<pallas_src>
import jax
import jax.numpy as jnp
from jax import lax
from jax.experimental import pallas as pl
from jax.experimental.pallas import tpu as pltpu


_NEG = -1e30   # finite "-inf": BCE(_NEG, 0) == 0 exactly, never NaN/Inf


def _bce_with_logits(x, y):
    """Numerically stable BCE-with-logits: max(x,0) - x*y + log1p(exp(-|x|))."""
    return jnp.maximum(x, 0.0) - x * y + jnp.log1p(jnp.exp(-jnp.abs(x)))


def _round_up(x, m):
    return -(-x // m) * m


# -----------------------------------------------------------------------------
# Packed path (C <= 128): row-major reshape (B, C_pad) -> (rows, 128) so every
# lane carries data; grid over packed-row tiles with BlockSpec pipelining.
# -----------------------------------------------------------------------------
def _make_packed_kernel(B, C, CP, loss_lambda):
    loss_lambda = float(loss_lambda)
    w_neu = loss_lambda / (2.0 * B)          # neutral term is a mean over B*2
    w_emo = (1.0 - loss_lambda) / (B * C)    # emotion term is a mean over B*C

    def kernel(e0_ref, e1_ref, out_ref, acc_emo, acc_neu):
        j = pl.program_id(1)                 # "arbitrary" reduction axis

        @pl.when(j == 0)
        def _init():
            acc_emo[...] = jnp.zeros_like(acc_emo)
            acc_neu[...] = jnp.zeros_like(acc_neu)

        e0 = e0_ref[...].astype(jnp.float32)   # targets (T,128), sentinel pad = 0
        e1 = e1_ref[...].astype(jnp.float32)   # logits  (T,128), sentinel pad = -1e30

        # Per-STEP lane bookkeeping on one vreg (not per data vreg).
        lane8 = lax.broadcasted_iota(jnp.int32, (8, 128), 1)
        col = lane8[0:1, :] % CP                       # (1,128) column within group
        is_last = col == (C - 1)                       # the neutral column
        # Probe pltpu.roll's rotate direction on a single vreg so the anchored
        # window extraction below is correct under either convention.  Keep
        # this probe in sync with the roll tree.
        anchor_col = jnp.where(
            pltpu.roll(lane8, 1, axis=1)[0:1, 0:1] > 1, CP - 1, 0)
        anchor = col == anchor_col                     # (1,128)

        # ---- loss_emotion: elementwise BCE; sentinel pads contribute 0 ------
        bce_all = _bce_with_logits(e1, e0)
        acc_emo[...] += bce_all

        # ---- loss_neutral ----------------------------------------------------
        # rest-max(e1) / rest-sum(e0) over the first C-1 real columns via a
        # log2(CP)-step roll tree (XLU slot); sentinel columns (-1e30 / 0) and
        # sentinel rows are no-ops.  The anchored lane of each CP-wide group
        # holds exactly that original row's reduction.
        y = jnp.where(is_last, _NEG, e1)
        z = jnp.where(is_last, 0.0, e0)
        s = 1
        while s < CP:
            y = jnp.maximum(y, pltpu.roll(y, s, axis=1))
            z = z + pltpu.roll(z, s, axis=1)
            s *= 2
        # TODO(synk): v7x-only — compact the 128//CP anchor lanes of CP data
        #             vregs into one dense vreg before this BCE to cut the
        #             duplicated EUP pass ~CPx (EUP is the ceiling there).
        acc_neu[...] += (jnp.where(is_last, bce_all, 0.0)
                         + jnp.where(anchor, _bce_with_logits(y, z), 0.0))

        @pl.when(j == pl.num_programs(1) - 1)
        def _finalize():
            part = (w_neu * jnp.sum(acc_neu[...])
                    + w_emo * jnp.sum(acc_emo[...]))
            # Lane-dense (1, 128) store; the wrapper reads column 0.
            out_ref[...] = jnp.full(out_ref.shape, part, out_ref.dtype)

    return kernel


def _emo_loss_packed(e0, e1, loss_lambda, B, C, tile_rows_req):
    CP = max(2, 1 << (C - 1).bit_length())   # next power of two >= C (divides 128)
    pack = 128 // CP                         # original rows per packed row
    itemsize = max(e0.dtype.itemsize, e1.dtype.itemsize)
    # Finite, very negative sentinel representable in the logits dtype.
    neg_pad = float(max(-1e30, float(jnp.finfo(e1.dtype).min)))

    align = 8 if itemsize >= 4 else 16
    n_rows = _round_up(B, pack) // pack      # packed rows needed
    # Biggest tile such that 2 inputs x 2 pipeline buffers + 2 f32 accumulators
    # stay under ~40 MiB -> fits v7x's 64 MiB per-core VMEM with headroom.
    max_tile = max(align,
                   ((40 << 20) // (128 * (4 * itemsize + 8)) // align) * align)
    tile_rows = min(_round_up(max(int(tile_rows_req), align), align),
                    _round_up(n_rows, align), max_tile)

    n_tiles = -(-n_rows // tile_rows)
    n_outer = 2 if n_tiles > 1 else 1        # guarantee the 2-way TC split (v7x)
    n_tiles = _round_up(n_tiles, n_outer)    # extra tile is all-sentinel -> adds 0
    n_inner = n_tiles // n_outer
    rows_pad = n_tiles * tile_rows
    b_pad = rows_pad * pack

    # Sentinel padding: logits -> very negative finite, targets -> 0, so padded
    # columns/rows contribute exactly 0 to every term (no in-kernel masking).
    if CP != C:
        e0 = jnp.pad(e0, ((0, 0), (0, CP - C)))
        e1 = jnp.pad(e1, ((0, 0), (0, CP - C)), constant_values=neg_pad)
    if b_pad != B:
        e0 = jnp.pad(e0, ((0, b_pad - B), (0, 0)))
        e1 = jnp.pad(e1, ((0, b_pad - B), (0, 0)), constant_values=neg_pad)
    e0p = e0.reshape(rows_pad, 128)          # free row-major reshape -> lane dense
    e1p = e1.reshape(rows_pad, 128)

    kernel = _make_packed_kernel(B, C, CP, loss_lambda)
    usage = (2 * tile_rows * 128 * (e0p.dtype.itemsize + e1p.dtype.itemsize)
             + 2 * tile_rows * 128 * 4)
    vmem_limit = int(min(usage + (4 << 20), 48 << 20))   # < v7x 64 MiB VMEM

    out = pl.pallas_call(
        kernel,
        out_shape=jax.ShapeDtypeStruct((n_outer, 128), jnp.float32),
        grid_spec=pltpu.PrefetchScalarGridSpec(
            num_scalar_prefetch=0,
            grid=(n_outer, n_inner),
            in_specs=[
                pl.BlockSpec((tile_rows, 128), lambda i, j: (i * n_inner + j, 0)),
                pl.BlockSpec((tile_rows, 128), lambda i, j: (i * n_inner + j, 0)),
            ],
            out_specs=pl.BlockSpec((1, 128), lambda i, j: (i, 0)),
            scratch_shapes=[pltpu.VMEM((tile_rows, 128), jnp.float32),
                            pltpu.VMEM((tile_rows, 128), jnp.float32)]),
        compiler_params=pltpu.CompilerParams(
            dimension_semantics=("parallel", "arbitrary"),
            vmem_limit_bytes=vmem_limit),
    )(e0p, e1p)
    return jnp.sum(out[:, 0])


# -----------------------------------------------------------------------------
# Row-tile path: only used for C > 128, where the natural (rows, C) layout is
# already lane-dense.  Static slices, persistent VMEM accumulator.
# -----------------------------------------------------------------------------
def _make_rowtile_kernel(B, C, loss_lambda, tile_rows):
    loss_lambda = float(loss_lambda)

    def kernel(e0_ref, e1_ref, out_ref, acc_ref):
        t = pl.program_id(0)

        @pl.when(t == 0)
        def _init():
            acc_ref[...] = jnp.zeros_like(acc_ref)

        e0 = e0_ref[...].astype(jnp.float32)   # (tile_rows, C) targets
        e1 = e1_ref[...].astype(jnp.float32)   # (tile_rows, C) logits

        row = lax.broadcasted_iota(jnp.int32, (tile_rows, 1), 0) + t * tile_rows
        validf = (row < B).astype(jnp.float32)            # mask padded rows

        bce_all = _bce_with_logits(e1, e0)
        emo_part = jnp.sum(bce_all * validf, keepdims=True)           # (1, 1)

        e0_last = e0[:, C - 1:C]
        e1_last = e1[:, C - 1:C]
        e0_rest_sum = jnp.sum(e0[:, :C - 1], axis=1, keepdims=True)
        e1_rest_max = jnp.max(e1[:, :C - 1], axis=1, keepdims=True)
        neu = (_bce_with_logits(e1_last, e0_last)
               + _bce_with_logits(e1_rest_max, e0_rest_sum)) * validf
        neu_part = jnp.sum(neu, keepdims=True)                        # (1, 1)

        acc_ref[0:1, 0:1] += emo_part
        acc_ref[1:2, 0:1] += neu_part

        @pl.when(t == pl.num_programs(0) - 1)
        def _finalize():
            emo_sum = jnp.sum(acc_ref[0:1, :])
            neu_sum = jnp.sum(acc_ref[1:2, :])
            loss = (loss_lambda * neu_sum / (2.0 * B)
                    + (1.0 - loss_lambda) * emo_sum / (B * C))
            out_ref[...] = jnp.full(out_ref.shape, loss, out_ref.dtype)

    return kernel


def _emo_loss_rowtile(e0, e1, loss_lambda, B, C, tile_rows_max):
    tile_rows = max(8, min(tile_rows_max, B))
    if tile_rows < B:
        tile_rows = ((tile_rows + 7) // 8) * 8
    n_tiles = -(-B // tile_rows)
    b_pad = tile_rows * n_tiles
    if b_pad != B:
        e0 = jnp.pad(e0, ((0, b_pad - B), (0, 0)))
        e1 = jnp.pad(e1, ((0, b_pad - B), (0, 0)))

    kernel = _make_rowtile_kernel(B, C, loss_lambda, tile_rows)
    block_bytes = tile_rows * C * e0.dtype.itemsize
    out = pl.pallas_call(
        kernel,
        out_shape=jax.ShapeDtypeStruct((1, 128), jnp.float32),
        grid_spec=pltpu.PrefetchScalarGridSpec(
            num_scalar_prefetch=0,
            grid=(n_tiles,),
            in_specs=[
                pl.BlockSpec((tile_rows, C), lambda t: (t, 0)),
                pl.BlockSpec((tile_rows, C), lambda t: (t, 0)),
            ],
            out_specs=pl.BlockSpec((1, 128), lambda t: (0, 0)),
            scratch_shapes=[pltpu.VMEM((2, 128), jnp.float32)]),
        compiler_params=pltpu.CompilerParams(
            dimension_semantics=("arbitrary",),
            vmem_limit_bytes=int(min(6 * block_bytes + (8 << 20), 48 << 20))),
    )(e0, e1)
    return out[0, 0]


# -----------------------------------------------------------------------------
# Public wrapper.
# -----------------------------------------------------------------------------
def emo_loss_pallas(e0, e1, loss_lambda, *, packed_tile_rows=8192,
                    rowtile_rows=None):
    """loss_lambda * loss_neutral + (1-loss_lambda) * loss_emotion (see spec).

    Inputs may be f32 / bf16 / f16; accumulation is always f32.
    """
    assert e0.shape == e1.shape and e0.ndim == 2
    B, C = e0.shape
    assert C >= 2, "need at least one emotion class plus the neutral column"
    if not jnp.issubdtype(e0.dtype, jnp.floating):
        e0 = e0.astype(jnp.float32)
    if not jnp.issubdtype(e1.dtype, jnp.floating):
        e1 = e1.astype(jnp.float32)
    if C <= 128:
        return _emo_loss_packed(e0, e1, loss_lambda, B, C, packed_tile_rows)
    # C > 128: the natural layout is already lane-dense.
    if rowtile_rows is None:
        rowtile_rows = max(16, ((2 << 20) // (C * 4) // 16) * 16)
    return _emo_loss_rowtile(e0, e1, loss_lambda, B, C, rowtile_rows)


def emo_loss_reference(e0, e1, loss_lambda):
    """Pure-JAX reference mirroring the PyTorch module (for self-check)."""
    e0 = e0.astype(jnp.float32)
    e1 = e1.astype(jnp.float32)
    e0_n = jnp.concatenate(
        [e0[:, -1:], jnp.sum(e0[:, :-1], axis=1, keepdims=True)], axis=1)
    e1_n = jnp.concatenate(
        [e1[:, -1:], jnp.max(e1[:, :-1], axis=1, keepdims=True)], axis=1)
    loss_neutral = jnp.mean(_bce_with_logits(e1_n, e0_n))
    loss_emotion = jnp.mean(_bce_with_logits(e1, e0))
    return loss_lambda * loss_neutral + (1.0 - loss_lambda) * loss_emotion


if __name__ == "__main__":
    LOSS_LAMBDA = 0.3
    key = jax.random.PRNGKey(0)

    # Small shapes exercising every packed code path: single tile, padded rows,
    # multi-tile with the 2-way core split, non-power-of-two C (column
    # sentinel padding), and bf16 inputs.
    cases = [
        (8, 8, jnp.float32, {}),                              # tiny demo size
        (64, 8, jnp.float32, {}),                             # single tile
        (100, 8, jnp.float32, {}),                            # padded rows
        (1000, 8, jnp.float32, {"packed_tile_rows": 8}),      # multi-tile + 2-way split
        (37, 6, jnp.float32, {}),                             # C padded 6 -> 8
        (50, 12, jnp.float32, {}),                            # C padded 12 -> 16
        (64, 8, jnp.bfloat16, {}),                            # bf16 inputs
    ]
    for idx, (B, C, dtype, kw) in enumerate(cases):
        key, k0, k1 = jax.random.split(key, 3)
        e0 = jax.random.uniform(k0, (B, C), dtype=jnp.float32).astype(dtype)
        e1 = jax.random.normal(k1, (B, C), dtype=jnp.float32).astype(dtype)
        got = jax.block_until_ready(emo_loss_pallas(e0, e1, LOSS_LAMBDA, **kw))
        want = jax.block_until_ready(emo_loss_reference(e0, e1, LOSS_LAMBDA))
        assert jnp.allclose(got, want, rtol=2e-5, atol=2e-5), (
            "mismatch", idx, B, C, str(dtype), got, want)

    print("KERNEL_OK")
</pallas_src>

<mosaic_0001>
module attributes {stable_mosaic.version = 11 : i64} {
  func.func @kernel(%arg0: i32, %arg1: i32, %arg2: memref<8x128xf32, #tpu.memory_space<vmem>>, %arg3: memref<8x128xf32, #tpu.memory_space<vmem>>, %arg4: memref<1x128xf32, #tpu.memory_space<vmem>>, %arg5: memref<8x128xf32, #tpu.memory_space<vmem>>, %arg6: memref<8x128xf32, #tpu.memory_space<vmem>>) attributes {dimension_semantics = [#tpu.dimension_semantics<parallel>, #tpu.dimension_semantics<arbitrary>], iteration_bounds = array<i64: 1, 1>, scalar_prefetch = 0 : i64, scratch_operands = 2 : i64, tpu.core_type = #tpu.core_type<tc>, window_params = [{transform_indices = @transform_0, window_bounds = array<i64: 8, 128>}, {transform_indices = @transform_1, window_bounds = array<i64: 8, 128>}, {transform_indices = @transform_2, window_bounds = array<i64: 1, 128>}]} {
    %c0_i32 = arith.constant 0 : i32
    %0 = arith.cmpi eq, %arg1, %c0_i32 : i32
    %1 = arith.extui %0 : i1 to i32
    %c0_i32_0 = arith.constant 0 : i32
    %2 = arith.cmpi ne, %1, %c0_i32_0 : i32
    scf.if %2 {
      %cst_33 = arith.constant 0.000000e+00 : f32
      %92 = vector.broadcast %cst_33 : f32 to vector<8x128xf32>
      %c0_34 = arith.constant 0 : index
      %c0_35 = arith.constant 0 : index
      %93 = vector.load %arg5[%c0_34, %c0_35] : memref<8x128xf32, #tpu.memory_space<vmem>>, vector<8x128xf32>
      tpu.vector_store %arg5[%c0_34, %c0_35], %92 {strides = array<i32>} : memref<8x128xf32, #tpu.memory_space<vmem>>, vector<8x128xf32>,
      %cst_36 = arith.constant 0.000000e+00 : f32
      %94 = vector.broadcast %cst_36 : f32 to vector<8x128xf32>
      %c0_37 = arith.constant 0 : index
      %c0_38 = arith.constant 0 : index
      %95 = vector.load %arg6[%c0_37, %c0_38] : memref<8x128xf32, #tpu.memory_space<vmem>>, vector<8x128xf32>
      tpu.vector_store %arg6[%c0_37, %c0_38], %94 {strides = array<i32>} : memref<8x128xf32, #tpu.memory_space<vmem>>, vector<8x128xf32>,
    } else {
    }
    %c0 = arith.constant 0 : index
    %c0_1 = arith.constant 0 : index
    %3 = vector.load %arg2[%c0, %c0_1] : memref<8x128xf32, #tpu.memory_space<vmem>>, vector<8x128xf32>
    %c0_2 = arith.constant 0 : index
    %c0_3 = arith.constant 0 : index
    %4 = vector.load %arg3[%c0_2, %c0_3] : memref<8x128xf32, #tpu.memory_space<vmem>>, vector<8x128xf32>
    %5 = tpu.iota {dimensions = array<i32: 1>} : vector<8x128xi32>
    %6 = vector.extract_strided_slice %5 {offsets = [0, 0], sizes = [1, 128], strides = [1, 1]} : vector<8x128xi32> to vector<1x128xi32>
    %c8_i32 = arith.constant 8 : i32
    %c0_i32_4 = arith.constant 0 : i32
    %7 = arith.cmpi eq, %c8_i32, %c0_i32_4 : i32
    %c1_i32 = arith.constant 1 : i32
    %8 = arith.select %7, %c1_i32, %c8_i32 : i32
    %9 = vector.broadcast %8 : i32 to vector<1x128xi32>
    %10 = arith.remsi %6, %9 : vector<1x128xi32>
    %c0_i32_5 = arith.constant 0 : i32
    %11 = vector.broadcast %c0_i32_5 : i32 to vector<1x128xi32>
    %12 = arith.cmpi ne, %10, %11 : vector<1x128xi32>
    %c0_i32_6 = arith.constant 0 : i32
    %13 = vector.broadcast %c0_i32_6 : i32 to vector<1x128xi32>
    %14 = arith.cmpi slt, %10, %13 : vector<1x128xi32>
    %c0_i32_7 = arith.constant 0 : i32
    %15 = arith.cmpi slt, %8, %c0_i32_7 : i32
    %16 = vector.broadcast %15 : i1 to vector<1x128xi1>
    %17 = vector.broadcast %16 : vector<1x128xi1> to vector<1x128xi1>
    %18 = arith.xori %14, %17 : vector<1x128xi1>
    %19 = arith.andi %18, %12 : vector<1x128xi1>
    %20 = vector.broadcast %8 : i32 to vector<1x128xi32>
    %21 = arith.addi %10, %20 : vector<1x128xi32>
    %22 = arith.select %19, %21, %10 : vector<1x128xi1>, vector<1x128xi32>
    %c7_i32 = arith.constant 7 : i32
    %23 = vector.broadcast %c7_i32 : i32 to vector<1x128xi32>
    %24 = arith.cmpi eq, %22, %23 : vector<1x128xi32>
    %c1_i32_8 = arith.constant 1 : i32
    %25 = tpu.dynamic_rotate %5 by %c1_i32_8 dim 1 : vector<8x128xi32>, i32 -> vector<8x128xi32>
    %26 = vector.extract_strided_slice %25 {offsets = [0, 0], sizes = [1, 1], strides = [1, 1]} : vector<8x128xi32> to vector<1x1xi32>
    %c1_i32_9 = arith.constant 1 : i32
    %27 = vector.broadcast %c1_i32_9 : i32 to vector<1x1xi32>
    %28 = arith.cmpi sgt, %26, %27 : vector<1x1xi32>
    %c7_i32_10 = arith.constant 7 : i32
    %c0_i32_11 = arith.constant 0 : i32
    %29 = vector.broadcast %c7_i32_10 : i32 to vector<1x1xi32>
    %30 = vector.broadcast %c0_i32_11 : i32 to vector<1x1xi32>
    %31 = arith.select %28, %29, %30 : vector<1x1xi1>, vector<1x1xi32>
    %32 = vector.broadcast %31 : vector<1x1xi32> to vector<1x128xi32>
    %33 = arith.cmpi eq, %22, %32 : vector<1x128xi32>
    %cst = arith.constant 0.000000e+00 : f32
    %34 = vector.broadcast %cst : f32 to vector<8x128xf32>
    %35 = arith.maximumf %4, %34 : vector<8x128xf32>
    %36 = arith.mulf %4, %3 : vector<8x128xf32>
    %37 = arith.subf %35, %36 : vector<8x128xf32>
    %38 = math.absf %4 : vector<8x128xf32>
    %cst_12 = arith.constant 0.000000e+00 : f32
    %39 = vector.broadcast %cst_12 : f32 to vector<8x128xf32>
    %40 = arith.subf %39, %38 : vector<8x128xf32>
    %41 = math.exp %40 : vector<8x128xf32>
    %42 = math.log1p %41 : vector<8x128xf32>
    %43 = arith.addf %37, %42 : vector<8x128xf32>
    %c0_13 = arith.constant 0 : index
    %c0_14 = arith.constant 0 : index
    %44 = vector.load %arg5[%c0_13, %c0_14] : memref<8x128xf32, #tpu.memory_space<vmem>>, vector<8x128xf32>
    %45 = arith.addf %44, %43 : vector<8x128xf32>
    %c0_15 = arith.constant 0 : index
    %c0_16 = arith.constant 0 : index
    %46 = vector.load %arg5[%c0_15, %c0_16] : memref<8x128xf32, #tpu.memory_space<vmem>>, vector<8x128xf32>
    tpu.vector_store %arg5[%c0_15, %c0_16], %45 {strides = array<i32>} : memref<8x128xf32, #tpu.memory_space<vmem>>, vector<8x128xf32>,
    %cst_17 = arith.constant -1.000000e+30 : f32
    %47 = vector.shape_cast %24 : vector<1x128xi1> to vector<1x128xi1>
    %48 = vector.broadcast %47 : vector<1x128xi1> to vector<8x128xi1>
    %49 = vector.broadcast %cst_17 : f32 to vector<8x128xf32>
    %50 = arith.select %48, %49, %4 : vector<8x128xi1>, vector<8x128xf32>
    %cst_18 = arith.constant 0.000000e+00 : f32
    %51 = vector.shape_cast %24 : vector<1x128xi1> to vector<1x128xi1>
    %52 = vector.broadcast %51 : vector<1x128xi1> to vector<8x128xi1>
    %53 = vector.broadcast %cst_18 : f32 to vector<8x128xf32>
    %54 = arith.select %52, %53, %3 : vector<8x128xi1>, vector<8x128xf32>
    %c1_i32_19 = arith.constant 1 : i32
    %55 = tpu.dynamic_rotate %50 by %c1_i32_19 dim 1 : vector<8x128xf32>, i32 -> vector<8x128xf32>
    %56 = arith.maximumf %50, %55 : vector<8x128xf32>
    %c1_i32_20 = arith.constant 1 : i32
    %57 = tpu.dynamic_rotate %54 by %c1_i32_20 dim 1 : vector<8x128xf32>, i32 -> vector<8x128xf32>
    %58 = arith.addf %54, %57 : vector<8x128xf32>
    %c2_i32 = arith.constant 2 : i32
    %59 = tpu.dynamic_rotate %56 by %c2_i32 dim 1 : vector<8x128xf32>, i32 -> vector<8x128xf32>
    %60 = arith.maximumf %56, %59 : vector<8x128xf32>
    %c2_i32_21 = arith.constant 2 : i32
    %61 = tpu.dynamic_rotate %58 by %c2_i32_21 dim 1 : vector<8x128xf32>, i32 -> vector<8x128xf32>
    %62 = arith.addf %58, %61 : vector<8x128xf32>
    %c4_i32 = arith.constant 4 : i32
    %63 = tpu.dynamic_rotate %60 by %c4_i32 dim 1 : vector<8x128xf32>, i32 -> vector<8x128xf32>
    %64 = arith.maximumf %60, %63 : vector<8x128xf32>
    %c4_i32_22 = arith.constant 4 : i32
    %65 = tpu.dynamic_rotate %62 by %c4_i32_22 dim 1 : vector<8x128xf32>, i32 -> vector<8x128xf32>
    %66 = arith.addf %62, %65 : vector<8x128xf32>
    %c0_23 = arith.constant 0 : index
    %c0_24 = arith.constant 0 : index
    %67 = vector.load %arg6[%c0_23, %c0_24] : memref<8x128xf32, #tpu.memory_space<vmem>>, vector<8x128xf32>
    %cst_25 = arith.constant 0.000000e+00 : f32
    %68 = vector.shape_cast %24 : vector<1x128xi1> to vector<1x128xi1>
    %69 = vector.broadcast %68 : vector<1x128xi1> to vector<8x128xi1>
    %70 = vector.broadcast %cst_25 : f32 to vector<8x128xf32>
    %71 = arith.select %69, %43, %70 : vector<8x128xi1>, vector<8x128xf32>
    %cst_26 = arith.constant 0.000000e+00 : f32
    %72 = vector.broadcast %cst_26 : f32 to vector<8x128xf32>
    %73 = arith.maximumf %64, %72 : vector<8x128xf32>
    %74 = arith.mulf %64, %66 : vector<8x128xf32>
    %75 = arith.subf %73, %74 : vector<8x128xf32>
    %76 = math.absf %64 : vector<8x128xf32>
    %cst_27 = arith.constant 0.000000e+00 : f32
    %77 = vector.broadcast %cst_27 : f32 to vector<8x128xf32>
    %78 = arith.subf %77, %76 : vector<8x128xf32>
    %79 = math.exp %78 : vector<8x128xf32>
    %80 = math.log1p %79 : vector<8x128xf32>
    %81 = arith.addf %75, %80 : vector<8x128xf32>
    %cst_28 = arith.constant 0.000000e+00 : f32
    %82 = vector.shape_cast %33 : vector<1x128xi1> to vector<1x128xi1>
    %83 = vector.broadcast %82 : vector<1x128xi1> to vector<8x128xi1>
    %84 = vector.broadcast %cst_28 : f32 to vector<8x128xf32>
    %85 = arith.select %83, %81, %84 : vector<8x128xi1>, vector<8x128xf32>
    %86 = arith.addf %71, %85 : vector<8x128xf32>
    %87 = arith.addf %67, %86 : vector<8x128xf32>
    %c0_29 = arith.constant 0 : index
    %c0_30 = arith.constant 0 : index
    %88 = vector.load %arg6[%c0_29, %c0_30] : memref<8x128xf32, #tpu.memory_space<vmem>>, vector<8x128xf32>
    tpu.vector_store %arg6[%c0_29, %c0_30], %87 {strides = array<i32>} : memref<8x128xf32, #tpu.memory_space<vmem>>, vector<8x128xf32>,
    %c0_i32_31 = arith.constant 0 : i32
    %89 = arith.cmpi eq, %arg1, %c0_i32_31 : i32
    %90 = arith.extui %89 : i1 to i32
    %c0_i32_32 = arith.constant 0 : i32
    %91 = arith.cmpi ne, %90, %c0_i32_32 : i32
    scf.if %91 {
      %c0_33 = arith.constant 0 : index
      %c0_34 = arith.constant 0 : index
      %92 = vector.load %arg6[%c0_33, %c0_34] : memref<8x128xf32, #tpu.memory_space<vmem>>, vector<8x128xf32>
      %93 = vector.shape_cast %92 : vector<8x128xf32> to vector<1x8x128xf32>
      %cst_35 = arith.constant dense<0.000000e+00> : vector<1xf32>
      %94 = vector.multi_reduction <add>, %93, %cst_35 [1, 2] : vector<1x8x128xf32> to vector<1xf32>
      %95 = vector.shape_cast %94 : vector<1xf32> to vector<1x1x1xf32>
      %96 = vector.extract %95[0, 0, 0] : f32 from vector<1x1x1xf32>
      %cst_36 = arith.constant 1.875000e-02 : f32
      %97 = arith.mulf %cst_36, %96 : f32
      %c0_37 = arith.constant 0 : index
      %c0_38 = arith.constant 0 : index
      %98 = vector.load %arg5[%c0_37, %c0_38] : memref<8x128xf32, #tpu.memory_space<vmem>>, vector<8x128xf32>
      %99 = vector.shape_cast %98 : vector<8x128xf32> to vector<1x8x128xf32>
      %cst_39 = arith.constant dense<0.000000e+00> : vector<1xf32>
      %100 = vector.multi_reduction <add>, %99, %cst_39 [1, 2] : vector<1x8x128xf32> to vector<1xf32>
      %101 = vector.shape_cast %100 : vector<1xf32> to vector<1x1x1xf32>
      %102 = vector.extract %101[0, 0, 0] : f32 from vector<1x1x1xf32>
      %cst_40 = arith.constant 1.093750e-02 : f32
      %103 = arith.mulf %cst_40, %102 : f32
      %104 = arith.addf %97, %103 : f32
      %105 = vector.broadcast %104 : f32 to vector<1x128xf32>
      %c0_41 = arith.constant 0 : index
      %c0_42 = arith.constant 0 : index
      %106 = vector.load %arg4[%c0_41, %c0_42] : memref<1x128xf32, #tpu.memory_space<vmem>>, vector<1x128xf32>
      tpu.vector_store %arg4[%c0_41, %c0_42], %105 {strides = array<i32>} : memref<1x128xf32, #tpu.memory_space<vmem>>, vector<1x128xf32>,
    } else {
    }
    return
  }
  func.func @transform_0(%arg0: i32, %arg1: i32) -> (i32, i32) {
    %c1_i32 = arith.constant 1 : i32
    %0 = arith.muli %arg0, %c1_i32 : i32
    %1 = arith.addi %0, %arg1 : i32
    %c0_i32 = arith.constant 0 : i32
    %c0_i32_0 = arith.constant 0 : i32
    return %1, %c0_i32 : i32, i32
  }
  func.func @transform_1(%arg0: i32, %arg1: i32) -> (i32, i32) {
    %c1_i32 = arith.constant 1 : i32
    %0 = arith.muli %arg0, %c1_i32 : i32
    %1 = arith.addi %0, %arg1 : i32
    %c0_i32 = arith.constant 0 : i32
    %c0_i32_0 = arith.constant 0 : i32
    return %1, %c0_i32 : i32, i32
  }
  func.func @transform_2(%arg0: i32, %arg1: i32) -> (i32, i32) {
    %c0_i32 = arith.constant 0 : i32
    %c0_i32_0 = arith.constant 0 : i32
    return %arg0, %c0_i32 : i32, i32
  }
}

</mosaic_0001>

<bundles_post_ra>
// kernel: tpu_custom_call.1
= control target key start
LH: loop header
LB: loop body
LE: loop exit
PB: predicated region body
PF: predicated region fallthrough
CT: control target
= control target key end

     0   :  { %7 = vsyncpa [#allocation5], 0  ;;  %s337_s0 = inlined_call_operand.hbm [shape: f32[8,128], index: 0, kind: input, shape index: {}]   ;;  %s338_s1 = inlined_call_operand.hbm [shape: f32[8,128], index: 1, kind: input, shape index: {}]   ;;  %s339_s2 = inlined_call_operand.hbm [shape: f32[1,128], index: 2, kind: output, shape index: {}]  }
   0x1   :  { %8 = vsyncpa [#allocation8], 0 }
   0x2   :  { %9 = vsyncpa [#allocation6], 0  ;;  %s18_s11 = sshll.u32 %s337_s0, 4  ;;  %s292_s12 = smov [#allocation4]   ;;  %s19_s11 = int_to_ptr.hbm [resolvable:$true] %s18_s11 }
   0x3   :  { %s20_s13 = sshll.u32 %s292_s12, 4  ;;  %s32_s16 = sshll.u32 %s338_s1, 4  ;;  %s21_s13 = int_to_ptr.vmem [resolvable:$true] %s20_s13  ;;  %s33_s16 = int_to_ptr.hbm [resolvable:$true] %s32_s16 }
   0x4   :  { %23 = dma.hbm_to_vmem [thread:$0]  %s19_s11, 128, %s21_s13, [#allocation5]  }
   0x5   :  { %s293_s17 = smov [#allocation7]  }
   0x6   :  { %s34_s18 = sshll.u32 %s293_s17, 4  ;;  %s35_s18 = int_to_ptr.vmem [resolvable:$true] %s34_s18 }
   0x7   :  { %37 = dma.hbm_to_vmem [thread:$0]  %s33_s16, 128, %s35_s18, [#allocation8]  }
   0x8   :  { %286 = dma.done.wait [#allocation5], 128  }
   0x9   :  { %287 = vsyncadd [#allocation5], 4294967168 }
   0xa   :  { %288 = dma.done.wait [#allocation8], 128  }
   0xb   :  { %289 = vsyncadd [#allocation8], 4294967168  ;;  %v56_v0 = vlaneseq  ;;  %s294_s0 = smov 1   ;;  %v55_v4 = vld [vmem:[#allocation7] sm:$0xff]  ;;  %v54_v6 = vld [vmem:[#allocation4] sm:$0xff]  ;;  %s295_s1 = smov 2  }
   0xc   :  { %v296_v13 = vmov 0   ;;  %s297_s19 = smov 4   ;;  %v82_v19 = vand.u32 2147483647, %v55_v4  ;;  %v80_v25 = vmul.f32 %v55_v4, %v54_v6  ;;  %v79_v29 = vmax.f32 %v55_v4, 0.0  ;;  %s298_s21 = smov [#allocation9]  }
   0xd   :  { %v320_v1 = vand.u32 127, %v56_v0  ;;  %204 = vset.pattern.permute.xlu1 %v296_v13  ;;  %205 = vset.pattern.permute.xlu0 %v296_v13  ;;  %s180_s22 = sshll.u32 %s298_s21, 4  ;;  %s182_s28 = sshll.u32 %s339_s2, 4  ;;  %s181_s22 = int_to_ptr.vmem [resolvable:$true] %s180_s22  ;;  %s183_s28 = int_to_ptr.hbm [resolvable:$true] %s182_s28 }
   0xe   :  { %v83_v20 = vsub.f32 0.0, %v82_v19  ;;  %v81_v34 = vsub.f32 %v79_v29, %v80_v25 }
   0xf   :  { %v62_v2 = vand.u32 7, %v320_v1  ;;  %71 = vrot.lane.b32.xlu2 %v320_v1, %s294_s0 }
  0x10   :  { %v84_v21 = vmul.f32 1.442695, %v83_v20 }
  0x11   :  { %vm324_vm0 = vcmp.eq.s32.totalorder %v62_v2, 7 }
  0x12   :  { %v101_v5 = vsel %vm324_vm0, -1e+30, %v55_v4  ;;  %v102_v7 = vsel %vm324_vm0, 0.0, %v54_v6  ;;  %206 = vpow2.f32 %v84_v21 }
  0x13   :  { %103 = vrot.lane.b32.xlu0 %v101_v5, %s294_s0 }
  0x18   :  { %v207_v22 = vpop.eup %206 }
  0x19   :  { %v86_v23 = vadd.f32 1.0, %v207_v22  ;;  %v89_v24 = vmul.f32 -0.5, %v207_v22  ;;  %v92_v30 = vand.u32 2147483647, %v207_v22 }
  0x1b   :  { %106 = vrot.lane.b32.xlu0 %v102_v7, %s294_s0  ;;  %208 = vlog2.f32 %v86_v23  ;;  %v90_v26 = vadd.f32 1.0, %v89_v24  ;;  %vm93_vm2 = vcmp.lt.f32.partialorder %v92_v30, 0.0004427343 }
  0x1d   :  { %v91_v33 = vmul.f32 %v207_v22, %v90_v26 }
  0x21   :  { %v209_v27 = vpop.eup %208 }
  0x22   :  { %v88_v32 = vmul.f32 0.6931472, %v209_v27 }
  0x24   :  { %v94_v36 = vsel %vm93_vm2, %v91_v33, %v88_v32 }
  0x25   :  { %v95_v37 = vadd.f32 %v94_v36, %v81_v34 }
  0x27   :  { %v122_v57 = vsel %vm324_vm0, %v95_v37, 0.0 }
  0x69   :  { %v72_v12 = vpop.permute.xlu2 %71 }
  0x6a   :  { %vm73_vm1 = vcmp.gt.s32.totalorder %v72_v12, 1 }
  0x6b   :  { %v74_v14 = vsel %vm73_vm1, 7, %v296_v13 }
  0x85   :  { %v104_v8 = vpop.permute.xlu0 %103 }
  0x86   :  { %v105_v9 = vmax.f32 %v101_v5, %v104_v8 }
  0x88   :  { %109 = vrot.lane.b32.xlu1 %v105_v9, %s295_s1 }
  0x8d   :  { %v107_v10 = vpop.permute.xlu0 %106 }
  0x8e   :  { %v108_v11 = vadd.f32 %v107_v10, %v102_v7 }
  0x90   :  { %112 = vrot.lane.b32.xlu1 %v108_v11, %s295_s1 }
  0x98   :  { %76 = vperm.xlu1 %204, %v74_v14  }
  0xfa   :  { %v110_v15 = vpop.permute.xlu1 %109 }
  0xfb   :  { %v111_v16 = vmax.f32 %v105_v9, %v110_v15 }
  0xfd   :  { %115 = vrot.lane.b32.xlu2 %v111_v16, %s297_s19 }
 0x102   :  { %v113_v17 = vpop.permute.xlu1 %112 }
 0x103   :  { %v114_v18 = vadd.f32 %v113_v17, %v108_v11 }
 0x105   :  { %118 = vrot.lane.b32.xlu0 %v114_v18, %s297_s19 }
 0x10a   :  { %v77_v42 = vpop.permute.xlu1 %76 }
 0x10b   :  { %vm78_vm3 = vcmp.eq.s32.totalorder %v62_v2, %v77_v42 }
 0x10c   :  { %v140_v45 = vsel %vm78_vm3, 1, %v296_v13 }
 0x10d   :  { %v141_v50 = vperm.slane %v140_v45, 0 }
 0x10f   :  { %vm142_vm5 = vcmp.eq.s32.totalorder %v141_v50, 1 }
 0x12f   :  { %162 = vadd.xlane.f32.xlu0 %v95_v37 }
 0x157   :  { %v116_v28 = vpop.permute.xlu2 %115 }
 0x158   :  { %v117_v31 = vmax.f32 %v111_v16, %v116_v28 }
 0x15a   :  { %v126_v35 = vand.u32 2147483647, %v117_v31  ;;  %v123_v52 = vmax.f32 %v117_v31, 0.0 }
 0x15c   :  { %v127_v38 = vsub.f32 0.0, %v126_v35 }
 0x15e   :  { %v128_v39 = vmul.f32 1.442695, %v127_v38 }
 0x160   :  { %210 = vpow2.f32 %v128_v39 }
 0x166   :  { %v211_v40 = vpop.eup %210 }
 0x167   :  { %v130_v41 = vadd.f32 1.0, %v211_v40  ;;  %v133_v43 = vmul.f32 -0.5, %v211_v40  ;;  %v136_v49 = vand.u32 2147483647, %v211_v40 }
 0x169   :  { %212 = vlog2.f32 %v130_v41  ;;  %v134_v47 = vadd.f32 1.0, %v133_v43  ;;  %vm137_vm4 = vcmp.lt.f32.partialorder %v136_v49, 0.0004427343 }
 0x16b   :  { %v135_v54 = vmul.f32 %v211_v40, %v134_v47 }
 0x16f   :  { %v213_v44 = vpop.eup %212 }
 0x170   :  { %v132_v51 = vmul.f32 0.6931472, %v213_v44 }
 0x172   :  { %v138_v56 = vsel %vm137_vm4, %v135_v54, %v132_v51 }
 0x177   :  { %v119_v46 = vpop.permute.xlu0 %118 }
 0x178   :  { %v120_v48 = vadd.f32 %v119_v46, %v114_v18 }
 0x17a   :  { %v124_v53 = vmul.f32 %v120_v48, %v117_v31 }
 0x17c   :  { %v125_v55 = vsub.f32 %v123_v52, %v124_v53 }
 0x17e   :  { %v139_v58 = vadd.f32 %v138_v56, %v125_v55 }
 0x180   :  { %v143_v59 = vsel %vm142_vm5, %v139_v58, 0.0 }
 0x181   :  { %v144_v60 = vadd.f32 %v143_v59, %v122_v57 }
 0x183   :  { %151 = vadd.xlane.f32.xlu2 %v144_v60 }
 0x1a2   :  { %v163_v61 = vpop.xlane.xlu0 %162 }
 0x1a3   :  { %v164_v62 = vrot.slane %v163_v61, 4 }
 0x1a5   :  { %v165_v63 = vadd.f32 %v164_v62, %v163_v61 }
 0x1a7   :  { %v166_v0 = vrot.slane %v165_v63, 2 }
 0x1a9   :  { %v167_v5 = vadd.f32 %v166_v0, %v165_v63 }
 0x1ab   :  { %v168_v8 = vrot.slane %v167_v5, 1 }
 0x1ad   :  { %v169_v11 = vadd.f32 %v168_v8, %v167_v5 }
 0x1f6   :  { %v152_v1 = vpop.xlane.xlu2 %151 }
 0x1f7   :  { %v153_v2 = vrot.slane %v152_v1, 4 }
 0x1f9   :  { %v154_v4 = vadd.f32 %v153_v2, %v152_v1 }
 0x1fb   :  { %v155_v6 = vrot.slane %v154_v4, 2 }
 0x1fd   :  { %v156_v7 = vadd.f32 %v155_v6, %v154_v4 }
 0x1ff   :  { %v157_v9 = vrot.slane %v156_v7, 1 }
 0x201   :  { %v158_v10 = vadd.f32 %v157_v9, %v156_v7 }
 0x203   :  { %193 = vpush %v158_v10 }
 0x204   :  { %195 = vpush %v169_v11 }
 0x234   :  { %s194_s20 = spop %193 }
 0x235   :  { %s160_s23 = smul.f32 0.01875, %s194_s20  ;;  %s196_s24 = spop %195 }
 0x236   :  { %s171_s25 = smul.f32 0.0109375, %s196_s24 }
 0x238   :  { %s172_s29 = sadd.f32 %s171_s25, %s160_s23 }
 0x23a   :  { %v173_v3 = vstv %s172_s29 }
 0x23b   :  { %174 = vst [vmem:[#allocation9] sm:$0x1] %v173_v3 }
 0x23c   :  { %185 = dma.vmem_to_hbm [thread:$0]  %s181_s22, 16, %s183_s28, [#allocation6]  }
 0x23d   :  { %290 = dma.done.wait [#allocation6], 16  }
 0x23e   :  { %291 = vsyncadd [#allocation6], 4294967280 }
 0x23f   :  { %190 = vsyncpa [#allocation5], 1 }
 0x240   :  { %191 = vsyncpa [#allocation8], 1 }
 0x241   :  { %192 = vsyncpa [#allocation6], 1 }

</bundles_post_ra>
